<compile_context>
chip_gen: v5e
topology: v5e:2x2
jax: 0.10.0
libtpu: 0.0.40
codegen_flags: <defaults>
</compile_context>

<pallas_src>
import math

import jax
import jax.numpy as jnp
from jax.experimental import pallas as pl
from jax.experimental.pallas import tpu as pltpu

# ---- small, module-consistent hyper-parameters -------------------------------
BATCH = 2
SEQ_LEN = 8
IN_FEATURES = 32          # in_features (model dim)
HIDDEN_FEATURES = 128     # hidden_features (mlp_ratio=4) -> lane-dense intermediate
DROPOUT_P = 0.1           # identity in eval-mode forward

_GELU_C = math.sqrt(2.0 / math.pi)


def _gelu_tanh(x):
    # tanh-approximate GELU: 0.5*x*(1 + tanh(sqrt(2/pi)*(x + 0.044715*x^3)))
    return 0.5 * x * (1.0 + jnp.tanh(_GELU_C * (x + 0.044715 * x * x * x)))


# ------------------------------- Pallas kernel --------------------------------
def mlp_kernel(x_ref, w1_ref, b1_ref, w2_ref, b2_ref, o_ref):
    f32 = jnp.float32
    x = x_ref[...].astype(f32)                                             # (TM, C)

    # fc1 + GELU  (Dropout p=0.1 is identity in eval mode)
    h = jnp.dot(x, w1_ref[...], preferred_element_type=f32) + b1_ref[...]  # (TM, H)
    h = _gelu_tanh(h)

    # fc2
    y = jnp.dot(h, w2_ref[...], preferred_element_type=f32) + b2_ref[...]  # (TM, C)
    o_ref[...] = y.astype(o_ref.dtype)


# --------------------------------- wrapper -------------------------------------
def mlp_forward(x, P, *, tm_max=512):
    B, L, C = x.shape
    H = P["w1_t"].shape[1]
    tokens = B * L

    # Fold batch & sequence into one token axis (single kernel step at small shapes).
    x2 = x.reshape(tokens, C)

    # Row tile: multiple of 8 (sublane), capped by tm_max.  Pad tokens to a multiple
    # of the tile so every grid block is full (no partial blocks).
    tm = min(tm_max, ((tokens + 7) // 8) * 8)
    tokens_p = pl.cdiv(tokens, tm) * tm
    if tokens_p != tokens:
        x2 = jnp.pad(x2, ((0, tokens_p - tokens), (0, 0)))

    grid = (tokens_p // tm,)

    out = pl.pallas_call(
        mlp_kernel,
        out_shape=jax.ShapeDtypeStruct((tokens_p, C), x.dtype),
        grid_spec=pltpu.PrefetchScalarGridSpec(
            num_scalar_prefetch=0,
            grid=grid,
            in_specs=[
                pl.BlockSpec((tm, C), lambda i: (i, 0)),   # token slab
                pl.BlockSpec((C, H), lambda i: (0, 0)),    # W1^T  (resident across grid)
                pl.BlockSpec((1, H), lambda i: (0, 0)),    # b1
                pl.BlockSpec((H, C), lambda i: (0, 0)),    # W2^T
                pl.BlockSpec((1, C), lambda i: (0, 0)),    # b2
            ],
            out_specs=pl.BlockSpec((tm, C), lambda i: (i, 0)),
        ),
        # Row tiles are independent -> "parallel" lets v7x shard them across its 2 TCs.
        compiler_params=pltpu.CompilerParams(dimension_semantics=("parallel",)),
    )(x2, P["w1_t"], P["b1"], P["w2_t"], P["b2"])

    return out[:tokens].reshape(B, L, C)


# ----------------------- deterministic parameter init -------------------------
def init_params(key):
    """PyTorch nn.Linear default init, repackaged (transposed) for (tokens, ch) layout."""
    C, H = IN_FEATURES, HIDDEN_FEATURES
    k1, k2, k3, k4 = jax.random.split(key, 4)

    def u(k, shape, fan_in):
        a = 1.0 / math.sqrt(fan_in)
        return jax.random.uniform(k, shape, jnp.float32, -a, a)

    w1 = u(k1, (H, C), C)          # mlp[0].weight  (hidden, in)
    b1 = u(k2, (H,), C)            # mlp[0].bias
    w2 = u(k3, (C, H), H)          # mlp[3].weight  (in, hidden)
    b2 = u(k4, (C,), H)            # mlp[3].bias

    return dict(
        w1_t=w1.T,                 # (C, H)
        b1=b1[None, :],            # (1, H)
        w2_t=w2.T,                 # (H, C)
        b2=b2[None, :],            # (1, C)
    )


# --------------------------- pure-JAX reference -------------------------------
def mlp_reference(x, P):
    h = _gelu_tanh(x @ P["w1_t"] + P["b1"][0])
    return h @ P["w2_t"] + P["b2"][0]


if __name__ == "__main__":
    key = jax.random.PRNGKey(0)
    kx, kp = jax.random.split(key)
    x = jax.random.normal(kx, (BATCH, SEQ_LEN, IN_FEATURES), jnp.float32)
    P = init_params(kp)

    out = mlp_forward(x, P)
    jax.block_until_ready(out)

    ref = mlp_reference(x, P)
    err = float(jnp.max(jnp.abs(out - ref)))
    assert out.shape == (BATCH, SEQ_LEN, IN_FEATURES), out.shape
    assert err < 1e-4, f"max abs err vs reference: {err}"
    print("KERNEL_OK")
</pallas_src>

<mosaic_0001>
module attributes {stable_mosaic.version = 11 : i64} {
  func.func @mlp_kernel(%arg0: i32, %arg1: memref<16x32xf32, #tpu.memory_space<vmem>>, %arg2: memref<32x128xf32, #tpu.memory_space<vmem>>, %arg3: memref<1x128xf32, #tpu.memory_space<vmem>>, %arg4: memref<128x32xf32, #tpu.memory_space<vmem>>, %arg5: memref<1x32xf32, #tpu.memory_space<vmem>>, %arg6: memref<16x32xf32, #tpu.memory_space<vmem>>) attributes {dimension_semantics = [#tpu.dimension_semantics<parallel>], iteration_bounds = array<i64: 1>, scalar_prefetch = 0 : i64, scratch_operands = 0 : i64, tpu.core_type = #tpu.core_type<tc>, window_params = [{transform_indices = @transform_0, window_bounds = array<i64: 16, 32>}, {pipeline_mode = #tpu.pipeline_mode<synchronous>, transform_indices = @transform_1, window_bounds = array<i64: 32, 128>}, {pipeline_mode = #tpu.pipeline_mode<synchronous>, transform_indices = @transform_2, window_bounds = array<i64: 1, 128>}, {pipeline_mode = #tpu.pipeline_mode<synchronous>, transform_indices = @transform_3, window_bounds = array<i64: 128, 32>}, {pipeline_mode = #tpu.pipeline_mode<synchronous>, transform_indices = @transform_4, window_bounds = array<i64: 1, 32>}, {transform_indices = @transform_5, window_bounds = array<i64: 16, 32>}]} {
    %c0 = arith.constant 0 : index
    %c0_0 = arith.constant 0 : index
    %0 = vector.load %arg1[%c0, %c0_0] : memref<16x32xf32, #tpu.memory_space<vmem>>, vector<16x32xf32>
    %c0_1 = arith.constant 0 : index
    %c0_2 = arith.constant 0 : index
    %1 = vector.load %arg2[%c0_1, %c0_2] : memref<32x128xf32, #tpu.memory_space<vmem>>, vector<32x128xf32>
    %cst = arith.constant dense<0.000000e+00> : vector<16x128xf32>
    %2 = tpu.matmul %0, %1, %cst {dimension_numbers = #tpu.dot_dimension_numbers<[1], [0], [0], [1], [0, 0, 1, 1], [], []>} : vector<16x32xf32>, vector<32x128xf32>, vector<16x128xf32> -> vector<16x128xf32>
    %c0_3 = arith.constant 0 : index
    %c0_4 = arith.constant 0 : index
    %3 = vector.load %arg3[%c0_3, %c0_4] : memref<1x128xf32, #tpu.memory_space<vmem>>, vector<1x128xf32>
    %4 = vector.broadcast %3 : vector<1x128xf32> to vector<16x128xf32>
    %5 = arith.addf %2, %4 : vector<16x128xf32>
    %cst_5 = arith.constant 5.000000e-01 : f32
    %6 = vector.broadcast %cst_5 : f32 to vector<16x128xf32>
    %7 = arith.mulf %6, %5 : vector<16x128xf32>
    %cst_6 = arith.constant 4.471500e-02 : f32
    %8 = vector.broadcast %cst_6 : f32 to vector<16x128xf32>
    %9 = arith.mulf %8, %5 : vector<16x128xf32>
    %10 = arith.mulf %9, %5 : vector<16x128xf32>
    %11 = arith.mulf %10, %5 : vector<16x128xf32>
    %12 = arith.addf %5, %11 : vector<16x128xf32>
    %cst_7 = arith.constant 0.797884583 : f32
    %13 = vector.broadcast %cst_7 : f32 to vector<16x128xf32>
    %14 = arith.mulf %13, %12 : vector<16x128xf32>
    %15 = math.tanh %14 : vector<16x128xf32>
    %cst_8 = arith.constant 1.000000e+00 : f32
    %16 = vector.broadcast %cst_8 : f32 to vector<16x128xf32>
    %17 = arith.addf %16, %15 : vector<16x128xf32>
    %18 = arith.mulf %7, %17 : vector<16x128xf32>
    %c0_9 = arith.constant 0 : index
    %c0_10 = arith.constant 0 : index
    %19 = vector.load %arg4[%c0_9, %c0_10] : memref<128x32xf32, #tpu.memory_space<vmem>>, vector<128x32xf32>
    %cst_11 = arith.constant dense<0.000000e+00> : vector<16x32xf32>
    %20 = tpu.matmul %18, %19, %cst_11 {dimension_numbers = #tpu.dot_dimension_numbers<[1], [0], [0], [1], [0, 0, 1, 1], [], []>} : vector<16x128xf32>, vector<128x32xf32>, vector<16x32xf32> -> vector<16x32xf32>
    %c0_12 = arith.constant 0 : index
    %c0_13 = arith.constant 0 : index
    %21 = vector.load %arg5[%c0_12, %c0_13] : memref<1x32xf32, #tpu.memory_space<vmem>>, vector<1x32xf32>
    %22 = vector.broadcast %21 : vector<1x32xf32> to vector<16x32xf32>
    %23 = arith.addf %20, %22 : vector<16x32xf32>
    %c0_14 = arith.constant 0 : index
    %c0_15 = arith.constant 0 : index
    %24 = vector.load %arg6[%c0_14, %c0_15] : memref<16x32xf32, #tpu.memory_space<vmem>>, vector<16x32xf32>
    tpu.vector_store %arg6[%c0_14, %c0_15], %23 {strides = array<i32>} : memref<16x32xf32, #tpu.memory_space<vmem>>, vector<16x32xf32>,
    return
  }
  func.func @transform_0(%arg0: i32) -> (i32, i32) {
    %c0_i32 = arith.constant 0 : i32
    %c0_i32_0 = arith.constant 0 : i32
    return %arg0, %c0_i32 : i32, i32
  }
  func.func @transform_1(%arg0: i32) -> (i32, i32) {
    %c0_i32 = arith.constant 0 : i32
    %c0_i32_0 = arith.constant 0 : i32
    %c0_i32_1 = arith.constant 0 : i32
    return %c0_i32, %c0_i32_0 : i32, i32
  }
  func.func @transform_2(%arg0: i32) -> (i32, i32) {
    %c0_i32 = arith.constant 0 : i32
    %c0_i32_0 = arith.constant 0 : i32
    %c0_i32_1 = arith.constant 0 : i32
    return %c0_i32, %c0_i32_0 : i32, i32
  }
  func.func @transform_3(%arg0: i32) -> (i32, i32) {
    %c0_i32 = arith.constant 0 : i32
    %c0_i32_0 = arith.constant 0 : i32
    %c0_i32_1 = arith.constant 0 : i32
    return %c0_i32, %c0_i32_0 : i32, i32
  }
  func.func @transform_4(%arg0: i32) -> (i32, i32) {
    %c0_i32 = arith.constant 0 : i32
    %c0_i32_0 = arith.constant 0 : i32
    %c0_i32_1 = arith.constant 0 : i32
    return %c0_i32, %c0_i32_0 : i32, i32
  }
  func.func @transform_5(%arg0: i32) -> (i32, i32) {
    %c0_i32 = arith.constant 0 : i32
    %c0_i32_0 = arith.constant 0 : i32
    return %arg0, %c0_i32 : i32, i32
  }
}

</mosaic_0001>

<bundles_post_ra>
// kernel: tpu_custom_call.1
= control target key start
LH: loop header
LB: loop body
LE: loop exit
PB: predicated region body
PF: predicated region fallthrough
CT: control target
= control target key end

     0   :  { %s307_s0 = inlined_call_operand.vmem [shape: f32[16,32], index: 0, kind: input, shape index: {}]   ;;  %s308_s1 = inlined_call_operand.vmem [shape: f32[32,128], index: 1, kind: input, shape index: {}]   ;;  %s309_s2 = inlined_call_operand.vmem [shape: f32[1,128], index: 2, kind: input, shape index: {}]   ;;  %s310_s3 = inlined_call_operand.vmem [shape: f32[128,32], index: 3, kind: input, shape index: {}]   ;;  %s311_s4 = inlined_call_operand.vmem [shape: f32[1,32], index: 4, kind: input, shape index: {}]   ;;  %s312_s5 = inlined_call_operand.hbm [shape: f32[16,32], index: 5, kind: output, shape index: {}]  }
   0x1   :  { %v26_v0 = vld [vmem:[%s308_s1 + $0x18] sm:$0xff]  ;;  %v25_v1 = vld [vmem:[%s308_s1 + $0x10] sm:$0xff]  ;;  %v24_v2 = vld [vmem:[%s308_s1 + $0x8] sm:$0xff] }
   0x2   :  { %50 = vmatpush.msra.mxu0 %v26_v0  ;;  %v94_v3 = vld [vmem:[%s310_s3 + $0x78] sm:$0xff]  ;;  %v93_v4 = vld [vmem:[%s310_s3 + $0x70] sm:$0xff]  ;;  %v23_v5 = vld [vmem:[%s308_s1] sm:$0xff] }
   0x3   :  { %99 = vmatpush.msra.mxu1 %v94_v3  ;;  %v92_v6 = vld [vmem:[%s310_s3 + $0x68] sm:$0xff]  ;;  %144 = vmatpush.msra.mxu2 %v94_v3 }
   0x4   :  { %51 = vmatpush.msra.mxu0 %v25_v1 }
   0x5   :  { %10 = vsyncpa [#allocation3], 0  ;;  %v21_v7 = vld [vmem:[%s307_s0] sm:$0xff]  ;;  %vm31_vm0 = vcmask 261120   ;;  %100 = vmatpush.msra.mxu1 %v93_v4  ;;  %145 = vmatpush.msra.mxu2 %v93_v4  ;;  %v22_v9 = vld [vmem:[%s307_s0 + $0x8] sm:$0xff]  ;;  %s195_s11 = smov [#allocation2]  }
   0x6   :  { %52 = vmatpush.msra.mxu0 %v24_v2  ;;  %v91_v8 = vld [vmem:[%s310_s3 + $0x60] sm:$0xff]  ;;  %v90_v10 = vld [vmem:[%s310_s3 + $0x58] sm:$0xff]  ;;  %v89_v11 = vld [vmem:[%s310_s3 + $0x50] sm:$0xff]  ;;  %s128_s12 = sshll.u32 %s195_s11, 4  ;;  %s130_s15 = sshll.u32 %s312_s5, 4  ;;  %s129_s12 = int_to_ptr.vmem [resolvable:$true] %s128_s12  ;;  %s131_s15 = int_to_ptr.hbm [resolvable:$true] %s130_s15 }
   0x7   :  { %101 = vmatpush.msra.mxu1 %v92_v6  ;;  %146 = vmatpush.msra.mxu2 %v92_v6  ;;  %v88_v12 = vld [vmem:[%s310_s3 + $0x48] sm:$0xff]  ;;  %v87_v13 = vld [vmem:[%s310_s3 + $0x40] sm:$0xff]  ;;  %v86_v14 = vld [vmem:[%s310_s3 + $0x38] sm:$0xff]  ;;  %s196_s16 = smov 128   ;;  %s197_s17 = smov 8  }
   0x8   :  { %53 = vmatpush.msra.mxu0 %v23_v5  ;;  %v85_v15 = vld [vmem:[%s310_s3 + $0x30] sm:$0xff]  ;;  %v84_v16 = vld [vmem:[%s310_s3 + $0x28] sm:$0xff]  ;;  %v83_v17 = vld [vmem:[%s310_s3 + $0x20] sm:$0xff] }
   0x9   :  { %142 = vmatmul.msk.f32.vlgmr.msra.gmra.mxu0 %vm31_vm0, %v21_v7  ;;  %102 = vmatpush.msra.mxu1 %v91_v8  ;;  %v82_v18 = vld [vmem:[%s310_s3 + $0x18] sm:$0xff]  ;;  %v81_v19 = vld [vmem:[%s310_s3 + $0x10] sm:$0xff]  ;;  %v80_v20 = vld [vmem:[%s310_s3 + $0x8] sm:$0xff] }
   0xa   :  { %147 = vmatpush.msra.mxu2 %v91_v8  ;;  %v79_v21 = vld [vmem:[%s310_s3] sm:$0xff] }
   0xb   :  { %103 = vmatpush.msra.mxu1 %v90_v10  ;;  %v163_v22 = vld [vmem:[%s309_s2] ss:$0 sm:$0xff] }
   0xc   :  { %148 = vmatpush.msra.mxu2 %v90_v10  ;;  %v164_v45 = vld [vmem:[%s311_s4] ss:$0 sm:$0xff] }
   0xd   :  { %104 = vmatpush.msra.mxu1 %v89_v11 }
   0xe   :  { %149 = vmatpush.msra.mxu2 %v89_v11 }
   0xf   :  { %105 = vmatpush.msra.mxu1 %v88_v12 }
  0x10   :  { %150 = vmatpush.msra.mxu2 %v88_v12 }
  0x11   :  { %143 = vmatmul.msk.f32.gmra.mxu0 %vm31_vm0, %v22_v9  ;;  %106 = vmatpush.msra.mxu1 %v87_v13 }
  0x12   :  { %151 = vmatpush.msra.mxu2 %v87_v13 }
  0x13   :  { %107 = vmatpush.msra.mxu1 %v86_v14 }
  0x14   :  { %152 = vmatpush.msra.mxu2 %v86_v14 }
  0x15   :  { %108 = vmatpush.msra.mxu1 %v85_v15 }
  0x16   :  { %153 = vmatpush.msra.mxu2 %v85_v15 }
  0x17   :  { %109 = vmatpush.msra.mxu1 %v84_v16 }
  0x18   :  { %154 = vmatpush.msra.mxu2 %v84_v16 }
  0x19   :  { %110 = vmatpush.msra.mxu1 %v83_v17 }
  0x1a   :  { %155 = vmatpush.msra.mxu2 %v83_v17 }
  0x1b   :  { %111 = vmatpush.msra.mxu1 %v82_v18 }
  0x1c   :  { %156 = vmatpush.msra.mxu2 %v82_v18 }
  0x1d   :  { %112 = vmatpush.msra.mxu1 %v81_v19 }
  0x1e   :  { %157 = vmatpush.msra.mxu2 %v81_v19 }
  0x1f   :  { %113 = vmatpush.msra.mxu1 %v80_v20 }
  0x20   :  { %158 = vmatpush.msra.mxu2 %v80_v20 }
  0x21   :  { %114 = vmatpush.msra.mxu1 %v79_v21 }
  0x22   :  { %159 = vmatpush.msra.mxu2 %v79_v21 }
  0x86   :  { %v55_v23 = vpop.f32.mrf.mxu0 }
  0x87   :  { %v56_v24 = vadd.f32 %v163_v22, %v55_v23 }
  0x89   :  { %v63_v25 = vmul.f32 0.044715, %v56_v24  ;;  %v61_v38 = vmul.f32 0.5, %v56_v24 }
  0x8b   :  { %v65_v26 = vmul.f32 %v63_v25, %v56_v24 }
  0x8d   :  { %v67_v27 = vmul.f32 %v65_v26, %v56_v24 }
  0x8e   :  { %v58_v28 = vpop.f32.mrf.mxu0 }
  0x8f   :  { %v59_v29 = vadd.f32 %v163_v22, %v58_v28  ;;  %v69_v30 = vadd.f32 %v67_v27, %v56_v24 }
  0x91   :  { %v71_v31 = vmul.f32 0.7978846, %v69_v30  ;;  %v64_v32 = vmul.f32 0.044715, %v59_v29  ;;  %v62_v42 = vmul.f32 0.5, %v59_v29 }
  0x93   :  { %165 = vtanh.f32 %v71_v31  ;;  %v66_v33 = vmul.f32 %v64_v32, %v59_v29 }
  0x95   :  { %v68_v34 = vmul.f32 %v66_v33, %v59_v29 }
  0x97   :  { %v70_v35 = vadd.f32 %v68_v34, %v59_v29 }
  0x99   :  { %v166_v36 = vpop.eup %165  ;;  %v72_v37 = vmul.f32 0.7978846, %v70_v35 }
  0x9a   :  { %v75_v39 = vadd.f32 1.0, %v166_v36 }
  0x9b   :  { %167 = vtanh.f32 %v72_v37 }
  0x9c   :  { %v77_v40 = vmul.f32 %v75_v39, %v61_v38 }
  0x9e   :  { %115 = vmatmul.f32.vlgmr.msra.gmra.mxu1 %v77_v40 }
  0xa1   :  { %v168_v41 = vpop.eup %167 }
  0xa2   :  { %v76_v43 = vadd.f32 1.0, %v168_v41 }
  0xa4   :  { %v78_v44 = vmul.f32 %v76_v43, %v62_v42 }
  0xa6   :  { %118 = vmatmul.f32.vlgmr.msra.gmra.mxu2 %v78_v44 }
 0x11b   :  { %v116_v46 = vpop.f32.mrf.mxu1 }
 0x11c   :  { %v117_v47 = vadd.f32 %v164_v45, %v116_v46 }
 0x11e   :  { %122 = vst.msk [vmem:[#allocation2] sm:$0xff] %vm31_vm0, %v117_v47 }
 0x129   :  { %v119_v48 = vpop.f32.mrf.mxu2 }
 0x12a   :  { %v120_v49 = vadd.f32 %v164_v45, %v119_v48 }
 0x12c   :  { %123 = vst.msk [vmem:[#allocation2 + $0x8] sm:$0xff] %vm31_vm0, %v120_v49 }
 0x12d   :  { %136 = dma.vmem_to_hbm [thread:$0]  %s129_s12, 256, %s131_s15, [#allocation3], %s196_s16, %s196_s16, %s197_s17  }
 0x12e   :  { %193 = dma.done.wait [#allocation3], 256  }
 0x12f   :  { %194 = vsyncadd [#allocation3], 4294967040 }
 0x130   :  { %141 = vsyncpa [#allocation3], 1 }

</bundles_post_ra>
